<compile_context>
chip_gen: v7x
topology: tpu7x:2x2x1
jax: 0.10.0
libtpu: 0.0.40
codegen_flags: <defaults>
</compile_context>

<pallas_src>
import functools

import numpy as np
import jax
import jax.numpy as jnp
from jax import lax
from jax.experimental import pallas as pl
from jax.experimental.pallas import tpu as pltpu

_LANE = 128
_EPS = 1e-6
_MAX_TILE_ROWS = 2048   # 2048x128xf32 = 1 MiB/buffer; 4 inputs x 2 buffers = 8 MiB VMEM
_ROW_ALIGN = 32         # covers f32 (8,128), bf16 (16,128), int8/fp8 (32,128) packing


def _round_up(x, m):
    return ((x + m - 1) // m) * m


def _bmn_tem_loss_kernel(pred_s_ref, gt_s_ref, pred_e_ref, gt_e_ref,
                         out_ref, acc_ref, *,
                         n_valid, tile_rows, last_valid, needs_mask):
    """Accumulates per-lane partial sums per tile; finalizes on the last step.

    acc_ref: VMEM f32[6, 8, 128]
      [0] pmask count (start)
      [1] sum where(pmask, log(p+eps), 0)      (start)
      [2] sum where(nmask, log(1-p+eps), 0)    (start)
      [3..5] same three quantities for the end branch.
    """
    step = pl.program_id(0)
    last_step = pl.num_programs(0) - 1

    @pl.when(step == 0)
    def _init():
        acc_ref[...] = jnp.zeros_like(acc_ref)

    def fold(x):
        # (tile_rows, 128) -> (8, 128): layout-preserving reshape + leading-axis
        # sum, i.e. pure vreg-wise VALU adds (no cross-lane XLU work per step).
        return jnp.sum(x.reshape(tile_rows // 8, 8, _LANE), axis=0)

    def accumulate(valid):
        def partials(pred_ref, gt_ref, base):
            pred = pred_ref[...].astype(jnp.float32)
            gt = gt_ref[...].astype(jnp.float32)
            raw_pos = gt > 0.5
            if valid is None:
                pos = raw_pos
                neg = jnp.logical_not(raw_pos)
            else:
                pos = jnp.logical_and(valid, raw_pos)
                neg = jnp.logical_and(valid, jnp.logical_not(raw_pos))
            lp = jnp.where(pos, jnp.log(pred + _EPS), 0.0)
            ln = jnp.where(neg, jnp.log(1.0 - pred + _EPS), 0.0)
            acc_ref[base + 0] = acc_ref[base + 0] + fold(pos.astype(jnp.float32))
            acc_ref[base + 1] = acc_ref[base + 1] + fold(lp)
            acc_ref[base + 2] = acc_ref[base + 2] + fold(ln)

        partials(pred_s_ref, gt_s_ref, 0)
        partials(pred_e_ref, gt_e_ref, 3)

    if needs_mask:
        # Only the globally-last tile contains host zero-padding and/or DMA
        # over-read; every earlier tile is fully valid (no iota mask needed).
        @pl.when(step < last_step)
        def _full_tile():
            accumulate(None)

        @pl.when(step == last_step)
        def _ragged_tile():
            row = lax.broadcasted_iota(jnp.int32, (tile_rows, _LANE), 0)
            col = lax.broadcasted_iota(jnp.int32, (tile_rows, _LANE), 1)
            valid = (row * _LANE + col) < last_valid
            accumulate(valid)
    else:
        accumulate(None)

    @pl.when(step == last_step)
    def _finalize():
        n = jnp.float32(n_valid)

        def branch(base):
            num_pos = jnp.sum(acc_ref[base + 0])
            sum_lp = jnp.sum(acc_ref[base + 1])
            sum_ln = jnp.sum(acc_ref[base + 2])
            ratio = n / num_pos            # same divide-by-zero behavior as PyTorch
            coef_1 = 0.5 * ratio
            coef_0 = 0.5 * ratio / (ratio - 1.0)
            # -mean(c1*lp*pm + c0*ln*nm) == -(c1*sum_lp + c0*sum_ln) / N
            return -(coef_1 * sum_lp + coef_0 * sum_ln) / n

        out_ref[0] = branch(0) + branch(3)


def bmn_loss(pred_start, pred_end, gt_start, gt_end):
    """Returns (loss, tem_loss) exactly like BMNLoss.forward (they are equal)."""
    n = pred_start.size
    assert pred_end.size == n and gt_start.size == n and gt_end.size == n

    rows = _round_up(pl.cdiv(n, _LANE), _ROW_ALIGN)
    padded = rows * _LANE
    tile_rows = min(_MAX_TILE_ROWS, rows)
    num_chunks = pl.cdiv(rows, tile_rows)
    last_valid = n - (num_chunks - 1) * tile_rows * _LANE
    needs_mask = last_valid < tile_rows * _LANE

    def prep(x):
        flat = jnp.ravel(x)                          # keep original dtype
        if padded != n:                              # at most 32*128-1 extra elems
            flat = jnp.pad(flat, (0, padded - n))    # zeros; masked out in-kernel
        return flat.reshape(rows, _LANE)

    inputs = [prep(pred_start), prep(gt_start), prep(pred_end), prep(gt_end)]
    bytes_in = sum(int(np.prod(a.shape)) * a.dtype.itemsize for a in inputs)

    tile_spec = pl.BlockSpec((tile_rows, _LANE), lambda i: (i, 0))
    kernel = functools.partial(
        _bmn_tem_loss_kernel,
        n_valid=n, tile_rows=tile_rows,
        last_valid=last_valid, needs_mask=needs_mask)

    # TODO(synk): on v7x, shard the row-chunk axis across both TensorCores
    # (CORE_PARALLEL leading grid axis + per-core partial sums combined in the
    # wrapper) to use both per-TC HBM paths; no effect on v5e/v6e (1 TC).
    out = pl.pallas_call(
        kernel,
        out_shape=jax.ShapeDtypeStruct((1,), jnp.float32),
        grid=(num_chunks,),
        in_specs=[tile_spec, tile_spec, tile_spec, tile_spec],
        out_specs=pl.BlockSpec(memory_space=pltpu.MemorySpace.SMEM),
        scratch_shapes=[pltpu.VMEM((6, 8, _LANE), jnp.float32)],
        compiler_params=pltpu.CompilerParams(
            dimension_semantics=("arbitrary",),
            vmem_limit_bytes=32 * 1024 * 1024),
        cost_estimate=pl.CostEstimate(
            flops=24 * padded,            # masks, selects, adds, folds (approx)
            transcendentals=4 * padded,   # 2 logs per pred element, 2 branches
            bytes_accessed=bytes_in + 4),
    )(*inputs)

    tem_loss = out[0]
    loss = tem_loss
    return loss, tem_loss


def _ref_bi_loss(pred, gt):
    pred = jnp.reshape(pred, (-1,)).astype(jnp.float32)
    gt = jnp.reshape(gt, (-1,)).astype(jnp.float32)
    pmask = (gt > 0.5).astype(jnp.float32)
    num_entries = pmask.shape[0]
    num_positive = jnp.sum(pmask)
    ratio = num_entries / num_positive
    coef_0 = 0.5 * ratio / (ratio - 1.0)
    coef_1 = 0.5 * ratio
    loss_pos = coef_1 * jnp.log(pred + _EPS) * pmask
    loss_neg = coef_0 * jnp.log(1.0 - pred + _EPS) * (1.0 - pmask)
    return -jnp.mean(loss_pos + loss_neg)


if __name__ == "__main__":
    # BMN temporal-evaluation head: per-frame start/end probabilities.
    B, T = 2, 256  # batch=2, temporal scale=256  -> N = 512 elements per tensor
    key = jax.random.PRNGKey(0)
    k1, k2, k3, k4 = jax.random.split(key, 4)

    pred_start = jax.random.uniform(k1, (B, T), dtype=jnp.float32, minval=0.01, maxval=0.99)
    pred_end = jax.random.uniform(k2, (B, T), dtype=jnp.float32, minval=0.01, maxval=0.99)
    gt_start = jax.random.uniform(k3, (B, T), dtype=jnp.float32)
    gt_end = jax.random.uniform(k4, (B, T), dtype=jnp.float32)

    loss, tem_loss = bmn_loss(pred_start, pred_end, gt_start, gt_end)
    loss = jax.block_until_ready(loss)

    ref = _ref_bi_loss(pred_start, gt_start) + _ref_bi_loss(pred_end, gt_end)
    assert np.allclose(np.asarray(loss), np.asarray(ref), rtol=1e-5, atol=1e-5)
    assert np.allclose(np.asarray(tem_loss), np.asarray(ref), rtol=1e-5, atol=1e-5)
    print("KERNEL_OK")
</pallas_src>

<mosaic_0001>
module attributes {stable_mosaic.version = 11 : i64} {
  func.func @_bmn_tem_loss_kernel(%arg0: i32, %arg1: memref<32x128xf32, #tpu.memory_space<vmem>>, %arg2: memref<32x128xf32, #tpu.memory_space<vmem>>, %arg3: memref<32x128xf32, #tpu.memory_space<vmem>>, %arg4: memref<32x128xf32, #tpu.memory_space<vmem>>, %arg5: memref<1xf32, #tpu.memory_space<smem>>, %arg6: memref<6x8x128xf32, #tpu.memory_space<vmem>>) attributes {dimension_semantics = [#tpu.dimension_semantics<arbitrary>], iteration_bounds = array<i64: 1>, scalar_prefetch = 0 : i64, scratch_operands = 1 : i64, tpu.core_type = #tpu.core_type<tc>, window_params = [{transform_indices = @transform_0, window_bounds = array<i64: 32, 128>}, {transform_indices = @transform_1, window_bounds = array<i64: 32, 128>}, {transform_indices = @transform_2, window_bounds = array<i64: 32, 128>}, {transform_indices = @transform_3, window_bounds = array<i64: 32, 128>}, {transform_indices = @transform_4, window_bounds = array<i64: 1>}]} {
    %c0_i32 = arith.constant 0 : i32
    %0 = arith.cmpi eq, %arg0, %c0_i32 : i32
    %1 = arith.extui %0 : i1 to i32
    %c0_i32_0 = arith.constant 0 : i32
    %2 = arith.cmpi ne, %1, %c0_i32_0 : i32
    scf.if %2 {
      %cst = arith.constant 0.000000e+00 : f32
      %12 = vector.broadcast %cst : f32 to vector<6x8x128xf32>
      %c0 = arith.constant 0 : index
      %c0_7 = arith.constant 0 : index
      %c0_8 = arith.constant 0 : index
      %13 = vector.load %arg6[%c0, %c0_7, %c0_8] : memref<6x8x128xf32, #tpu.memory_space<vmem>>, vector<6x8x128xf32>
      tpu.vector_store %arg6[%c0, %c0_7, %c0_8], %12 {strides = array<i32>} : memref<6x8x128xf32, #tpu.memory_space<vmem>>, vector<6x8x128xf32>,
    } else {
    }
    %c0_i32_1 = arith.constant 0 : i32
    %3 = arith.cmpi slt, %arg0, %c0_i32_1 : i32
    %4 = arith.extui %3 : i1 to i32
    %c0_i32_2 = arith.constant 0 : i32
    %5 = arith.cmpi ne, %4, %c0_i32_2 : i32
    scf.if %5 {
      %c0 = arith.constant 0 : index
      %c0_7 = arith.constant 0 : index
      %12 = vector.load %arg1[%c0, %c0_7] : memref<32x128xf32, #tpu.memory_space<vmem>>, vector<32x128xf32>
      %c0_8 = arith.constant 0 : index
      %c0_9 = arith.constant 0 : index
      %13 = vector.load %arg2[%c0_8, %c0_9] : memref<32x128xf32, #tpu.memory_space<vmem>>, vector<32x128xf32>
      %cst = arith.constant 5.000000e-01 : f32
      %14 = vector.broadcast %cst : f32 to vector<32x128xf32>
      %15 = arith.cmpf ogt, %13, %14 : vector<32x128xf32>
      %cst_10 = arith.constant dense<true> : vector<32x128xi1>
      %16 = arith.xori %15, %cst_10 : vector<32x128xi1>
      %cst_11 = arith.constant 9.99999997E-7 : f32
      %17 = vector.broadcast %cst_11 : f32 to vector<32x128xf32>
      %18 = arith.addf %12, %17 : vector<32x128xf32>
      %19 = math.log %18 : vector<32x128xf32>
      %cst_12 = arith.constant 0.000000e+00 : f32
      %20 = vector.broadcast %cst_12 : f32 to vector<32x128xf32>
      %21 = arith.select %15, %19, %20 : vector<32x128xi1>, vector<32x128xf32>
      %cst_13 = arith.constant 1.000000e+00 : f32
      %22 = vector.broadcast %cst_13 : f32 to vector<32x128xf32>
      %23 = arith.subf %22, %12 : vector<32x128xf32>
      %cst_14 = arith.constant 9.99999997E-7 : f32
      %24 = vector.broadcast %cst_14 : f32 to vector<32x128xf32>
      %25 = arith.addf %23, %24 : vector<32x128xf32>
      %26 = math.log %25 : vector<32x128xf32>
      %cst_15 = arith.constant 0.000000e+00 : f32
      %27 = vector.broadcast %cst_15 : f32 to vector<32x128xf32>
      %28 = arith.select %16, %26, %27 : vector<32x128xi1>, vector<32x128xf32>
      %c0_16 = arith.constant 0 : index
      %c0_17 = arith.constant 0 : index
      %c0_18 = arith.constant 0 : index
      %29 = vector.load %arg6[%c0_16, %c0_17, %c0_18] : memref<6x8x128xf32, #tpu.memory_space<vmem>>, vector<1x8x128xf32>
      %30 = vector.shape_cast %29 : vector<1x8x128xf32> to vector<8x128xf32>
      %31 = arith.extui %15 : vector<32x128xi1> to vector<32x128xi32>
      %32 = arith.sitofp %31 : vector<32x128xi32> to vector<32x128xf32>
      %33 = vector.shape_cast %32 : vector<32x128xf32> to vector<4x8x128xf32>
      %cst_19 = arith.constant dense<0.000000e+00> : vector<8x128xf32>
      %34 = vector.multi_reduction <add>, %33, %cst_19 [0] : vector<4x8x128xf32> to vector<8x128xf32>
      %35 = arith.addf %30, %34 : vector<8x128xf32>
      %c0_20 = arith.constant 0 : index
      %c0_21 = arith.constant 0 : index
      %c0_22 = arith.constant 0 : index
      %36 = vector.load %arg6[%c0_20, %c0_21, %c0_22] : memref<6x8x128xf32, #tpu.memory_space<vmem>>, vector<1x8x128xf32>
      %37 = vector.shape_cast %36 : vector<1x8x128xf32> to vector<8x128xf32>
      %38 = vector.shape_cast %35 : vector<8x128xf32> to vector<1x8x128xf32>
      tpu.vector_store %arg6[%c0_20, %c0_21, %c0_22], %38 {strides = array<i32>} : memref<6x8x128xf32, #tpu.memory_space<vmem>>, vector<1x8x128xf32>,
      %c1 = arith.constant 1 : index
      %c0_23 = arith.constant 0 : index
      %c0_24 = arith.constant 0 : index
      %39 = vector.load %arg6[%c1, %c0_23, %c0_24] : memref<6x8x128xf32, #tpu.memory_space<vmem>>, vector<1x8x128xf32>
      %40 = vector.shape_cast %39 : vector<1x8x128xf32> to vector<8x128xf32>
      %41 = vector.shape_cast %21 : vector<32x128xf32> to vector<4x8x128xf32>
      %cst_25 = arith.constant dense<0.000000e+00> : vector<8x128xf32>
      %42 = vector.multi_reduction <add>, %41, %cst_25 [0] : vector<4x8x128xf32> to vector<8x128xf32>
      %43 = arith.addf %40, %42 : vector<8x128xf32>
      %c1_26 = arith.constant 1 : index
      %c0_27 = arith.constant 0 : index
      %c0_28 = arith.constant 0 : index
      %44 = vector.load %arg6[%c1_26, %c0_27, %c0_28] : memref<6x8x128xf32, #tpu.memory_space<vmem>>, vector<1x8x128xf32>
      %45 = vector.shape_cast %44 : vector<1x8x128xf32> to vector<8x128xf32>
      %46 = vector.shape_cast %43 : vector<8x128xf32> to vector<1x8x128xf32>
      tpu.vector_store %arg6[%c1_26, %c0_27, %c0_28], %46 {strides = array<i32>} : memref<6x8x128xf32, #tpu.memory_space<vmem>>, vector<1x8x128xf32>,
      %c2 = arith.constant 2 : index
      %c0_29 = arith.constant 0 : index
      %c0_30 = arith.constant 0 : index
      %47 = vector.load %arg6[%c2, %c0_29, %c0_30] : memref<6x8x128xf32, #tpu.memory_space<vmem>>, vector<1x8x128xf32>
      %48 = vector.shape_cast %47 : vector<1x8x128xf32> to vector<8x128xf32>
      %49 = vector.shape_cast %28 : vector<32x128xf32> to vector<4x8x128xf32>
      %cst_31 = arith.constant dense<0.000000e+00> : vector<8x128xf32>
      %50 = vector.multi_reduction <add>, %49, %cst_31 [0] : vector<4x8x128xf32> to vector<8x128xf32>
      %51 = arith.addf %48, %50 : vector<8x128xf32>
      %c2_32 = arith.constant 2 : index
      %c0_33 = arith.constant 0 : index
      %c0_34 = arith.constant 0 : index
      %52 = vector.load %arg6[%c2_32, %c0_33, %c0_34] : memref<6x8x128xf32, #tpu.memory_space<vmem>>, vector<1x8x128xf32>
      %53 = vector.shape_cast %52 : vector<1x8x128xf32> to vector<8x128xf32>
      %54 = vector.shape_cast %51 : vector<8x128xf32> to vector<1x8x128xf32>
      tpu.vector_store %arg6[%c2_32, %c0_33, %c0_34], %54 {strides = array<i32>} : memref<6x8x128xf32, #tpu.memory_space<vmem>>, vector<1x8x128xf32>,
      %c0_35 = arith.constant 0 : index
      %c0_36 = arith.constant 0 : index
      %55 = vector.load %arg3[%c0_35, %c0_36] : memref<32x128xf32, #tpu.memory_space<vmem>>, vector<32x128xf32>
      %c0_37 = arith.constant 0 : index
      %c0_38 = arith.constant 0 : index
      %56 = vector.load %arg4[%c0_37, %c0_38] : memref<32x128xf32, #tpu.memory_space<vmem>>, vector<32x128xf32>
      %cst_39 = arith.constant 5.000000e-01 : f32
      %57 = vector.broadcast %cst_39 : f32 to vector<32x128xf32>
      %58 = arith.cmpf ogt, %56, %57 : vector<32x128xf32>
      %cst_40 = arith.constant dense<true> : vector<32x128xi1>
      %59 = arith.xori %58, %cst_40 : vector<32x128xi1>
      %cst_41 = arith.constant 9.99999997E-7 : f32
      %60 = vector.broadcast %cst_41 : f32 to vector<32x128xf32>
      %61 = arith.addf %55, %60 : vector<32x128xf32>
      %62 = math.log %61 : vector<32x128xf32>
      %cst_42 = arith.constant 0.000000e+00 : f32
      %63 = vector.broadcast %cst_42 : f32 to vector<32x128xf32>
      %64 = arith.select %58, %62, %63 : vector<32x128xi1>, vector<32x128xf32>
      %cst_43 = arith.constant 1.000000e+00 : f32
      %65 = vector.broadcast %cst_43 : f32 to vector<32x128xf32>
      %66 = arith.subf %65, %55 : vector<32x128xf32>
      %cst_44 = arith.constant 9.99999997E-7 : f32
      %67 = vector.broadcast %cst_44 : f32 to vector<32x128xf32>
      %68 = arith.addf %66, %67 : vector<32x128xf32>
      %69 = math.log %68 : vector<32x128xf32>
      %cst_45 = arith.constant 0.000000e+00 : f32
      %70 = vector.broadcast %cst_45 : f32 to vector<32x128xf32>
      %71 = arith.select %59, %69, %70 : vector<32x128xi1>, vector<32x128xf32>
      %c3 = arith.constant 3 : index
      %c0_46 = arith.constant 0 : index
      %c0_47 = arith.constant 0 : index
      %72 = vector.load %arg6[%c3, %c0_46, %c0_47] : memref<6x8x128xf32, #tpu.memory_space<vmem>>, vector<1x8x128xf32>
      %73 = vector.shape_cast %72 : vector<1x8x128xf32> to vector<8x128xf32>
      %74 = arith.extui %58 : vector<32x128xi1> to vector<32x128xi32>
      %75 = arith.sitofp %74 : vector<32x128xi32> to vector<32x128xf32>
      %76 = vector.shape_cast %75 : vector<32x128xf32> to vector<4x8x128xf32>
      %cst_48 = arith.constant dense<0.000000e+00> : vector<8x128xf32>
      %77 = vector.multi_reduction <add>, %76, %cst_48 [0] : vector<4x8x128xf32> to vector<8x128xf32>
      %78 = arith.addf %73, %77 : vector<8x128xf32>
      %c3_49 = arith.constant 3 : index
      %c0_50 = arith.constant 0 : index
      %c0_51 = arith.constant 0 : index
      %79 = vector.load %arg6[%c3_49, %c0_50, %c0_51] : memref<6x8x128xf32, #tpu.memory_space<vmem>>, vector<1x8x128xf32>
      %80 = vector.shape_cast %79 : vector<1x8x128xf32> to vector<8x128xf32>
      %81 = vector.shape_cast %78 : vector<8x128xf32> to vector<1x8x128xf32>
      tpu.vector_store %arg6[%c3_49, %c0_50, %c0_51], %81 {strides = array<i32>} : memref<6x8x128xf32, #tpu.memory_space<vmem>>, vector<1x8x128xf32>,
      %c4 = arith.constant 4 : index
      %c0_52 = arith.constant 0 : index
      %c0_53 = arith.constant 0 : index
      %82 = vector.load %arg6[%c4, %c0_52, %c0_53] : memref<6x8x128xf32, #tpu.memory_space<vmem>>, vector<1x8x128xf32>
      %83 = vector.shape_cast %82 : vector<1x8x128xf32> to vector<8x128xf32>
      %84 = vector.shape_cast %64 : vector<32x128xf32> to vector<4x8x128xf32>
      %cst_54 = arith.constant dense<0.000000e+00> : vector<8x128xf32>
      %85 = vector.multi_reduction <add>, %84, %cst_54 [0] : vector<4x8x128xf32> to vector<8x128xf32>
      %86 = arith.addf %83, %85 : vector<8x128xf32>
      %c4_55 = arith.constant 4 : index
      %c0_56 = arith.constant 0 : index
      %c0_57 = arith.constant 0 : index
      %87 = vector.load %arg6[%c4_55, %c0_56, %c0_57] : memref<6x8x128xf32, #tpu.memory_space<vmem>>, vector<1x8x128xf32>
      %88 = vector.shape_cast %87 : vector<1x8x128xf32> to vector<8x128xf32>
      %89 = vector.shape_cast %86 : vector<8x128xf32> to vector<1x8x128xf32>
      tpu.vector_store %arg6[%c4_55, %c0_56, %c0_57], %89 {strides = array<i32>} : memref<6x8x128xf32, #tpu.memory_space<vmem>>, vector<1x8x128xf32>,
      %c5 = arith.constant 5 : index
      %c0_58 = arith.constant 0 : index
      %c0_59 = arith.constant 0 : index
      %90 = vector.load %arg6[%c5, %c0_58, %c0_59] : memref<6x8x128xf32, #tpu.memory_space<vmem>>, vector<1x8x128xf32>
      %91 = vector.shape_cast %90 : vector<1x8x128xf32> to vector<8x128xf32>
      %92 = vector.shape_cast %71 : vector<32x128xf32> to vector<4x8x128xf32>
      %cst_60 = arith.constant dense<0.000000e+00> : vector<8x128xf32>
      %93 = vector.multi_reduction <add>, %92, %cst_60 [0] : vector<4x8x128xf32> to vector<8x128xf32>
      %94 = arith.addf %91, %93 : vector<8x128xf32>
      %c5_61 = arith.constant 5 : index
      %c0_62 = arith.constant 0 : index
      %c0_63 = arith.constant 0 : index
      %95 = vector.load %arg6[%c5_61, %c0_62, %c0_63] : memref<6x8x128xf32, #tpu.memory_space<vmem>>, vector<1x8x128xf32>
      %96 = vector.shape_cast %95 : vector<1x8x128xf32> to vector<8x128xf32>
      %97 = vector.shape_cast %94 : vector<8x128xf32> to vector<1x8x128xf32>
      tpu.vector_store %arg6[%c5_61, %c0_62, %c0_63], %97 {strides = array<i32>} : memref<6x8x128xf32, #tpu.memory_space<vmem>>, vector<1x8x128xf32>,
    } else {
    }
    %c0_i32_3 = arith.constant 0 : i32
    %6 = arith.cmpi eq, %arg0, %c0_i32_3 : i32
    %7 = arith.extui %6 : i1 to i32
    %c0_i32_4 = arith.constant 0 : i32
    %8 = arith.cmpi ne, %7, %c0_i32_4 : i32
    scf.if %8 {
      %12 = tpu.iota {dimensions = array<i32: 0>} : vector<32x128xi32>
      %13 = tpu.iota {dimensions = array<i32: 1>} : vector<32x128xi32>
      %c128_i32 = arith.constant 128 : i32
      %14 = vector.broadcast %c128_i32 : i32 to vector<32x128xi32>
      %15 = arith.muli %12, %14 : vector<32x128xi32>
      %16 = arith.addi %15, %13 : vector<32x128xi32>
      %c512_i32 = arith.constant 512 : i32
      %17 = vector.broadcast %c512_i32 : i32 to vector<32x128xi32>
      %18 = arith.cmpi slt, %16, %17 : vector<32x128xi32>
      %c0 = arith.constant 0 : index
      %c0_7 = arith.constant 0 : index
      %19 = vector.load %arg1[%c0, %c0_7] : memref<32x128xf32, #tpu.memory_space<vmem>>, vector<32x128xf32>
      %c0_8 = arith.constant 0 : index
      %c0_9 = arith.constant 0 : index
      %20 = vector.load %arg2[%c0_8, %c0_9] : memref<32x128xf32, #tpu.memory_space<vmem>>, vector<32x128xf32>
      %cst = arith.constant 5.000000e-01 : f32
      %21 = vector.broadcast %cst : f32 to vector<32x128xf32>
      %22 = arith.cmpf ogt, %20, %21 : vector<32x128xf32>
      %23 = arith.andi %18, %22 : vector<32x128xi1>
      %cst_10 = arith.constant dense<true> : vector<32x128xi1>
      %24 = arith.xori %22, %cst_10 : vector<32x128xi1>
      %25 = arith.andi %18, %24 : vector<32x128xi1>
      %cst_11 = arith.constant 9.99999997E-7 : f32
      %26 = vector.broadcast %cst_11 : f32 to vector<32x128xf32>
      %27 = arith.addf %19, %26 : vector<32x128xf32>
      %28 = math.log %27 : vector<32x128xf32>
      %cst_12 = arith.constant 0.000000e+00 : f32
      %29 = vector.broadcast %cst_12 : f32 to vector<32x128xf32>
      %30 = arith.select %23, %28, %29 : vector<32x128xi1>, vector<32x128xf32>
      %cst_13 = arith.constant 1.000000e+00 : f32
      %31 = vector.broadcast %cst_13 : f32 to vector<32x128xf32>
      %32 = arith.subf %31, %19 : vector<32x128xf32>
      %cst_14 = arith.constant 9.99999997E-7 : f32
      %33 = vector.broadcast %cst_14 : f32 to vector<32x128xf32>
      %34 = arith.addf %32, %33 : vector<32x128xf32>
      %35 = math.log %34 : vector<32x128xf32>
      %cst_15 = arith.constant 0.000000e+00 : f32
      %36 = vector.broadcast %cst_15 : f32 to vector<32x128xf32>
      %37 = arith.select %25, %35, %36 : vector<32x128xi1>, vector<32x128xf32>
      %c0_16 = arith.constant 0 : index
      %c0_17 = arith.constant 0 : index
      %c0_18 = arith.constant 0 : index
      %38 = vector.load %arg6[%c0_16, %c0_17, %c0_18] : memref<6x8x128xf32, #tpu.memory_space<vmem>>, vector<1x8x128xf32>
      %39 = vector.shape_cast %38 : vector<1x8x128xf32> to vector<8x128xf32>
      %40 = arith.extui %23 : vector<32x128xi1> to vector<32x128xi32>
      %41 = arith.sitofp %40 : vector<32x128xi32> to vector<32x128xf32>
      %42 = vector.shape_cast %41 : vector<32x128xf32> to vector<4x8x128xf32>
      %cst_19 = arith.constant dense<0.000000e+00> : vector<8x128xf32>
      %43 = vector.multi_reduction <add>, %42, %cst_19 [0] : vector<4x8x128xf32> to vector<8x128xf32>
      %44 = arith.addf %39, %43 : vector<8x128xf32>
      %c0_20 = arith.constant 0 : index
      %c0_21 = arith.constant 0 : index
      %c0_22 = arith.constant 0 : index
      %45 = vector.load %arg6[%c0_20, %c0_21, %c0_22] : memref<6x8x128xf32, #tpu.memory_space<vmem>>, vector<1x8x128xf32>
      %46 = vector.shape_cast %45 : vector<1x8x128xf32> to vector<8x128xf32>
      %47 = vector.shape_cast %44 : vector<8x128xf32> to vector<1x8x128xf32>
      tpu.vector_store %arg6[%c0_20, %c0_21, %c0_22], %47 {strides = array<i32>} : memref<6x8x128xf32, #tpu.memory_space<vmem>>, vector<1x8x128xf32>,
      %c1 = arith.constant 1 : index
      %c0_23 = arith.constant 0 : index
      %c0_24 = arith.constant 0 : index
      %48 = vector.load %arg6[%c1, %c0_23, %c0_24] : memref<6x8x128xf32, #tpu.memory_space<vmem>>, vector<1x8x128xf32>
      %49 = vector.shape_cast %48 : vector<1x8x128xf32> to vector<8x128xf32>
      %50 = vector.shape_cast %30 : vector<32x128xf32> to vector<4x8x128xf32>
      %cst_25 = arith.constant dense<0.000000e+00> : vector<8x128xf32>
      %51 = vector.multi_reduction <add>, %50, %cst_25 [0] : vector<4x8x128xf32> to vector<8x128xf32>
      %52 = arith.addf %49, %51 : vector<8x128xf32>
      %c1_26 = arith.constant 1 : index
      %c0_27 = arith.constant 0 : index
      %c0_28 = arith.constant 0 : index
      %53 = vector.load %arg6[%c1_26, %c0_27, %c0_28] : memref<6x8x128xf32, #tpu.memory_space<vmem>>, vector<1x8x128xf32>
      %54 = vector.shape_cast %53 : vector<1x8x128xf32> to vector<8x128xf32>
      %55 = vector.shape_cast %52 : vector<8x128xf32> to vector<1x8x128xf32>
      tpu.vector_store %arg6[%c1_26, %c0_27, %c0_28], %55 {strides = array<i32>} : memref<6x8x128xf32, #tpu.memory_space<vmem>>, vector<1x8x128xf32>,
      %c2 = arith.constant 2 : index
      %c0_29 = arith.constant 0 : index
      %c0_30 = arith.constant 0 : index
      %56 = vector.load %arg6[%c2, %c0_29, %c0_30] : memref<6x8x128xf32, #tpu.memory_space<vmem>>, vector<1x8x128xf32>
      %57 = vector.shape_cast %56 : vector<1x8x128xf32> to vector<8x128xf32>
      %58 = vector.shape_cast %37 : vector<32x128xf32> to vector<4x8x128xf32>
      %cst_31 = arith.constant dense<0.000000e+00> : vector<8x128xf32>
      %59 = vector.multi_reduction <add>, %58, %cst_31 [0] : vector<4x8x128xf32> to vector<8x128xf32>
      %60 = arith.addf %57, %59 : vector<8x128xf32>
      %c2_32 = arith.constant 2 : index
      %c0_33 = arith.constant 0 : index
      %c0_34 = arith.constant 0 : index
      %61 = vector.load %arg6[%c2_32, %c0_33, %c0_34] : memref<6x8x128xf32, #tpu.memory_space<vmem>>, vector<1x8x128xf32>
      %62 = vector.shape_cast %61 : vector<1x8x128xf32> to vector<8x128xf32>
      %63 = vector.shape_cast %60 : vector<8x128xf32> to vector<1x8x128xf32>
      tpu.vector_store %arg6[%c2_32, %c0_33, %c0_34], %63 {strides = array<i32>} : memref<6x8x128xf32, #tpu.memory_space<vmem>>, vector<1x8x128xf32>,
      %c0_35 = arith.constant 0 : index
      %c0_36 = arith.constant 0 : index
      %64 = vector.load %arg3[%c0_35, %c0_36] : memref<32x128xf32, #tpu.memory_space<vmem>>, vector<32x128xf32>
      %c0_37 = arith.constant 0 : index
      %c0_38 = arith.constant 0 : index
      %65 = vector.load %arg4[%c0_37, %c0_38] : memref<32x128xf32, #tpu.memory_space<vmem>>, vector<32x128xf32>
      %cst_39 = arith.constant 5.000000e-01 : f32
      %66 = vector.broadcast %cst_39 : f32 to vector<32x128xf32>
      %67 = arith.cmpf ogt, %65, %66 : vector<32x128xf32>
      %68 = arith.andi %18, %67 : vector<32x128xi1>
      %cst_40 = arith.constant dense<true> : vector<32x128xi1>
      %69 = arith.xori %67, %cst_40 : vector<32x128xi1>
      %70 = arith.andi %18, %69 : vector<32x128xi1>
      %cst_41 = arith.constant 9.99999997E-7 : f32
      %71 = vector.broadcast %cst_41 : f32 to vector<32x128xf32>
      %72 = arith.addf %64, %71 : vector<32x128xf32>
      %73 = math.log %72 : vector<32x128xf32>
      %cst_42 = arith.constant 0.000000e+00 : f32
      %74 = vector.broadcast %cst_42 : f32 to vector<32x128xf32>
      %75 = arith.select %68, %73, %74 : vector<32x128xi1>, vector<32x128xf32>
      %cst_43 = arith.constant 1.000000e+00 : f32
      %76 = vector.broadcast %cst_43 : f32 to vector<32x128xf32>
      %77 = arith.subf %76, %64 : vector<32x128xf32>
      %cst_44 = arith.constant 9.99999997E-7 : f32
      %78 = vector.broadcast %cst_44 : f32 to vector<32x128xf32>
      %79 = arith.addf %77, %78 : vector<32x128xf32>
      %80 = math.log %79 : vector<32x128xf32>
      %cst_45 = arith.constant 0.000000e+00 : f32
      %81 = vector.broadcast %cst_45 : f32 to vector<32x128xf32>
      %82 = arith.select %70, %80, %81 : vector<32x128xi1>, vector<32x128xf32>
      %c3 = arith.constant 3 : index
      %c0_46 = arith.constant 0 : index
      %c0_47 = arith.constant 0 : index
      %83 = vector.load %arg6[%c3, %c0_46, %c0_47] : memref<6x8x128xf32, #tpu.memory_space<vmem>>, vector<1x8x128xf32>
      %84 = vector.shape_cast %83 : vector<1x8x128xf32> to vector<8x128xf32>
      %85 = arith.extui %68 : vector<32x128xi1> to vector<32x128xi32>
      %86 = arith.sitofp %85 : vector<32x128xi32> to vector<32x128xf32>
      %87 = vector.shape_cast %86 : vector<32x128xf32> to vector<4x8x128xf32>
      %cst_48 = arith.constant dense<0.000000e+00> : vector<8x128xf32>
      %88 = vector.multi_reduction <add>, %87, %cst_48 [0] : vector<4x8x128xf32> to vector<8x128xf32>
      %89 = arith.addf %84, %88 : vector<8x128xf32>
      %c3_49 = arith.constant 3 : index
      %c0_50 = arith.constant 0 : index
      %c0_51 = arith.constant 0 : index
      %90 = vector.load %arg6[%c3_49, %c0_50, %c0_51] : memref<6x8x128xf32, #tpu.memory_space<vmem>>, vector<1x8x128xf32>
      %91 = vector.shape_cast %90 : vector<1x8x128xf32> to vector<8x128xf32>
      %92 = vector.shape_cast %89 : vector<8x128xf32> to vector<1x8x128xf32>
      tpu.vector_store %arg6[%c3_49, %c0_50, %c0_51], %92 {strides = array<i32>} : memref<6x8x128xf32, #tpu.memory_space<vmem>>, vector<1x8x128xf32>,
      %c4 = arith.constant 4 : index
      %c0_52 = arith.constant 0 : index
      %c0_53 = arith.constant 0 : index
      %93 = vector.load %arg6[%c4, %c0_52, %c0_53] : memref<6x8x128xf32, #tpu.memory_space<vmem>>, vector<1x8x128xf32>
      %94 = vector.shape_cast %93 : vector<1x8x128xf32> to vector<8x128xf32>
      %95 = vector.shape_cast %75 : vector<32x128xf32> to vector<4x8x128xf32>
      %cst_54 = arith.constant dense<0.000000e+00> : vector<8x128xf32>
      %96 = vector.multi_reduction <add>, %95, %cst_54 [0] : vector<4x8x128xf32> to vector<8x128xf32>
      %97 = arith.addf %94, %96 : vector<8x128xf32>
      %c4_55 = arith.constant 4 : index
      %c0_56 = arith.constant 0 : index
      %c0_57 = arith.constant 0 : index
      %98 = vector.load %arg6[%c4_55, %c0_56, %c0_57] : memref<6x8x128xf32, #tpu.memory_space<vmem>>, vector<1x8x128xf32>
      %99 = vector.shape_cast %98 : vector<1x8x128xf32> to vector<8x128xf32>
      %100 = vector.shape_cast %97 : vector<8x128xf32> to vector<1x8x128xf32>
      tpu.vector_store %arg6[%c4_55, %c0_56, %c0_57], %100 {strides = array<i32>} : memref<6x8x128xf32, #tpu.memory_space<vmem>>, vector<1x8x128xf32>,
      %c5 = arith.constant 5 : index
      %c0_58 = arith.constant 0 : index
      %c0_59 = arith.constant 0 : index
      %101 = vector.load %arg6[%c5, %c0_58, %c0_59] : memref<6x8x128xf32, #tpu.memory_space<vmem>>, vector<1x8x128xf32>
      %102 = vector.shape_cast %101 : vector<1x8x128xf32> to vector<8x128xf32>
      %103 = vector.shape_cast %82 : vector<32x128xf32> to vector<4x8x128xf32>
      %cst_60 = arith.constant dense<0.000000e+00> : vector<8x128xf32>
      %104 = vector.multi_reduction <add>, %103, %cst_60 [0] : vector<4x8x128xf32> to vector<8x128xf32>
      %105 = arith.addf %102, %104 : vector<8x128xf32>
      %c5_61 = arith.constant 5 : index
      %c0_62 = arith.constant 0 : index
      %c0_63 = arith.constant 0 : index
      %106 = vector.load %arg6[%c5_61, %c0_62, %c0_63] : memref<6x8x128xf32, #tpu.memory_space<vmem>>, vector<1x8x128xf32>
      %107 = vector.shape_cast %106 : vector<1x8x128xf32> to vector<8x128xf32>
      %108 = vector.shape_cast %105 : vector<8x128xf32> to vector<1x8x128xf32>
      tpu.vector_store %arg6[%c5_61, %c0_62, %c0_63], %108 {strides = array<i32>} : memref<6x8x128xf32, #tpu.memory_space<vmem>>, vector<1x8x128xf32>,
    } else {
    }
    %c0_i32_5 = arith.constant 0 : i32
    %9 = arith.cmpi eq, %arg0, %c0_i32_5 : i32
    %10 = arith.extui %9 : i1 to i32
    %c0_i32_6 = arith.constant 0 : i32
    %11 = arith.cmpi ne, %10, %c0_i32_6 : i32
    scf.if %11 {
      %c0 = arith.constant 0 : index
      %c0_7 = arith.constant 0 : index
      %c0_8 = arith.constant 0 : index
      %12 = vector.load %arg6[%c0, %c0_7, %c0_8] : memref<6x8x128xf32, #tpu.memory_space<vmem>>, vector<1x8x128xf32>
      %13 = vector.shape_cast %12 : vector<1x8x128xf32> to vector<8x128xf32>
      %14 = vector.shape_cast %13 : vector<8x128xf32> to vector<1x8x128xf32>
      %cst = arith.constant dense<0.000000e+00> : vector<1xf32>
      %15 = vector.multi_reduction <add>, %14, %cst [1, 2] : vector<1x8x128xf32> to vector<1xf32>
      %16 = vector.shape_cast %15 : vector<1xf32> to vector<1x1x1xf32>
      %17 = vector.extract %16[0, 0, 0] : f32 from vector<1x1x1xf32>
      %c1 = arith.constant 1 : index
      %c0_9 = arith.constant 0 : index
      %c0_10 = arith.constant 0 : index
      %18 = vector.load %arg6[%c1, %c0_9, %c0_10] : memref<6x8x128xf32, #tpu.memory_space<vmem>>, vector<1x8x128xf32>
      %19 = vector.shape_cast %18 : vector<1x8x128xf32> to vector<8x128xf32>
      %20 = vector.shape_cast %19 : vector<8x128xf32> to vector<1x8x128xf32>
      %cst_11 = arith.constant dense<0.000000e+00> : vector<1xf32>
      %21 = vector.multi_reduction <add>, %20, %cst_11 [1, 2] : vector<1x8x128xf32> to vector<1xf32>
      %22 = vector.shape_cast %21 : vector<1xf32> to vector<1x1x1xf32>
      %23 = vector.extract %22[0, 0, 0] : f32 from vector<1x1x1xf32>
      %c2 = arith.constant 2 : index
      %c0_12 = arith.constant 0 : index
      %c0_13 = arith.constant 0 : index
      %24 = vector.load %arg6[%c2, %c0_12, %c0_13] : memref<6x8x128xf32, #tpu.memory_space<vmem>>, vector<1x8x128xf32>
      %25 = vector.shape_cast %24 : vector<1x8x128xf32> to vector<8x128xf32>
      %26 = vector.shape_cast %25 : vector<8x128xf32> to vector<1x8x128xf32>
      %cst_14 = arith.constant dense<0.000000e+00> : vector<1xf32>
      %27 = vector.multi_reduction <add>, %26, %cst_14 [1, 2] : vector<1x8x128xf32> to vector<1xf32>
      %28 = vector.shape_cast %27 : vector<1xf32> to vector<1x1x1xf32>
      %29 = vector.extract %28[0, 0, 0] : f32 from vector<1x1x1xf32>
      %cst_15 = arith.constant 5.120000e+02 : f32
      %30 = arith.divf %cst_15, %17 : f32
      %cst_16 = arith.constant 5.000000e-01 : f32
      %31 = arith.mulf %cst_16, %30 : f32
      %cst_17 = arith.constant 5.000000e-01 : f32
      %32 = arith.mulf %cst_17, %30 : f32
      %cst_18 = arith.constant 1.000000e+00 : f32
      %33 = arith.subf %30, %cst_18 : f32
      %34 = arith.divf %32, %33 : f32
      %35 = arith.mulf %31, %23 : f32
      %36 = arith.mulf %34, %29 : f32
      %37 = arith.addf %35, %36 : f32
      %cst_19 = arith.constant 0.000000e+00 : f32
      %38 = arith.subf %cst_19, %37 : f32
      %cst_20 = arith.constant 5.120000e+02 : f32
      %39 = arith.divf %38, %cst_20 : f32
      %c3 = arith.constant 3 : index
      %c0_21 = arith.constant 0 : index
      %c0_22 = arith.constant 0 : index
      %40 = vector.load %arg6[%c3, %c0_21, %c0_22] : memref<6x8x128xf32, #tpu.memory_space<vmem>>, vector<1x8x128xf32>
      %41 = vector.shape_cast %40 : vector<1x8x128xf32> to vector<8x128xf32>
      %42 = vector.shape_cast %41 : vector<8x128xf32> to vector<1x8x128xf32>
      %cst_23 = arith.constant dense<0.000000e+00> : vector<1xf32>
      %43 = vector.multi_reduction <add>, %42, %cst_23 [1, 2] : vector<1x8x128xf32> to vector<1xf32>
      %44 = vector.shape_cast %43 : vector<1xf32> to vector<1x1x1xf32>
      %45 = vector.extract %44[0, 0, 0] : f32 from vector<1x1x1xf32>
      %c4 = arith.constant 4 : index
      %c0_24 = arith.constant 0 : index
      %c0_25 = arith.constant 0 : index
      %46 = vector.load %arg6[%c4, %c0_24, %c0_25] : memref<6x8x128xf32, #tpu.memory_space<vmem>>, vector<1x8x128xf32>
      %47 = vector.shape_cast %46 : vector<1x8x128xf32> to vector<8x128xf32>
      %48 = vector.shape_cast %47 : vector<8x128xf32> to vector<1x8x128xf32>
      %cst_26 = arith.constant dense<0.000000e+00> : vector<1xf32>
      %49 = vector.multi_reduction <add>, %48, %cst_26 [1, 2] : vector<1x8x128xf32> to vector<1xf32>
      %50 = vector.shape_cast %49 : vector<1xf32> to vector<1x1x1xf32>
      %51 = vector.extract %50[0, 0, 0] : f32 from vector<1x1x1xf32>
      %c5 = arith.constant 5 : index
      %c0_27 = arith.constant 0 : index
      %c0_28 = arith.constant 0 : index
      %52 = vector.load %arg6[%c5, %c0_27, %c0_28] : memref<6x8x128xf32, #tpu.memory_space<vmem>>, vector<1x8x128xf32>
      %53 = vector.shape_cast %52 : vector<1x8x128xf32> to vector<8x128xf32>
      %54 = vector.shape_cast %53 : vector<8x128xf32> to vector<1x8x128xf32>
      %cst_29 = arith.constant dense<0.000000e+00> : vector<1xf32>
      %55 = vector.multi_reduction <add>, %54, %cst_29 [1, 2] : vector<1x8x128xf32> to vector<1xf32>
      %56 = vector.shape_cast %55 : vector<1xf32> to vector<1x1x1xf32>
      %57 = vector.extract %56[0, 0, 0] : f32 from vector<1x1x1xf32>
      %cst_30 = arith.constant 5.120000e+02 : f32
      %58 = arith.divf %cst_30, %45 : f32
      %cst_31 = arith.constant 5.000000e-01 : f32
      %59 = arith.mulf %cst_31, %58 : f32
      %cst_32 = arith.constant 5.000000e-01 : f32
      %60 = arith.mulf %cst_32, %58 : f32
      %cst_33 = arith.constant 1.000000e+00 : f32
      %61 = arith.subf %58, %cst_33 : f32
      %62 = arith.divf %60, %61 : f32
      %63 = arith.mulf %59, %51 : f32
      %64 = arith.mulf %62, %57 : f32
      %65 = arith.addf %63, %64 : f32
      %cst_34 = arith.constant 0.000000e+00 : f32
      %66 = arith.subf %cst_34, %65 : f32
      %cst_35 = arith.constant 5.120000e+02 : f32
      %67 = arith.divf %66, %cst_35 : f32
      %68 = arith.addf %39, %67 : f32
      %c0_36 = arith.constant 0 : index
      %69 = memref.load %arg5[%c0_36] : memref<1xf32, #tpu.memory_space<smem>>
      memref.store %68, %arg5[%c0_36] : memref<1xf32, #tpu.memory_space<smem>>
    } else {
    }
    return
  }
  func.func @transform_0(%arg0: i32) -> (i32, i32) {
    %c0_i32 = arith.constant 0 : i32
    %c0_i32_0 = arith.constant 0 : i32
    return %arg0, %c0_i32 : i32, i32
  }
  func.func @transform_1(%arg0: i32) -> (i32, i32) {
    %c0_i32 = arith.constant 0 : i32
    %c0_i32_0 = arith.constant 0 : i32
    return %arg0, %c0_i32 : i32, i32
  }
  func.func @transform_2(%arg0: i32) -> (i32, i32) {
    %c0_i32 = arith.constant 0 : i32
    %c0_i32_0 = arith.constant 0 : i32
    return %arg0, %c0_i32 : i32, i32
  }
  func.func @transform_3(%arg0: i32) -> (i32, i32) {
    %c0_i32 = arith.constant 0 : i32
    %c0_i32_0 = arith.constant 0 : i32
    return %arg0, %c0_i32 : i32, i32
  }
  func.func @transform_4(%arg0: i32) -> i32 {
    %c0_i32 = arith.constant 0 : i32
    %c0_i32_0 = arith.constant 0 : i32
    return %c0_i32 : i32
  }
}

</mosaic_0001>

<bundles_post_ra>
// kernel: tpu_custom_call.1
= control target key start
LH: loop header
LB: loop body
LE: loop exit
PB: predicated region body
PF: predicated region fallthrough
CT: control target
= control target key end

     0   :  { %9 = vsyncpa [#allocation4], 0  ;;  %s1111_s0 = inlined_call_operand.hbm [shape: f32[32,128], index: 0, kind: input, shape index: {}]   ;;  %s1112_s1 = inlined_call_operand.hbm [shape: f32[32,128], index: 1, kind: input, shape index: {}]   ;;  %s1113_s2 = inlined_call_operand.hbm [shape: f32[32,128], index: 2, kind: input, shape index: {}]   ;;  %s1114_s3 = inlined_call_operand.hbm [shape: f32[32,128], index: 3, kind: input, shape index: {}]   ;;  %s1115_s4 = inlined_call_operand.hbm [shape: f32[1], index: 4, kind: output, shape index: {}]  }
   0x1   :  { %10 = vsyncpa [#allocation7], 0 }
   0x2   :  { %11 = vsyncpa [#allocation10], 0 }
   0x3   :  { %12 = vsyncpa [#allocation5], 0  ;;  %s753_s15 = smov [#allocation6]   ;;  %s754_s17 = smov [#allocation3]  }
   0x4   :  { %s30_s16 = sshll.u32 %s753_s15, 4  ;;  %s18_s18 = sshll.u32 %s754_s17, 4  ;;  %s31_s16 = int_to_ptr.vmem [resolvable:$true] %s30_s16  ;;  %s787_s18 = int_to_ptr.vmem [resolvable:$true] %s18_s18 }
   0x5   :  { %s647_s21 = scalar_lea.hbm %s1112_s1, 512 }
   0x6   :  { %p648_p0 = scmp.ne.s32.totalorder %s1112_s1, %s647_s21  ;;  %p651_p1 = scmp.lt.u32.totalorder %s647_s21, %s1112_s1 }
   0x8   :  { %p653_p2 = pnand %p651_p1, %p648_p0 }
   0xa   :  { %656 = shalt.err (!%p653_p2)
}
   0xb   :  { %s657_s26 = scalar_lea.vmem %s31_s16, 512  ;;  %p662_p4 = scmp.lt.s32.totalorder %s31_s16, %s31_s16 }
   0xc   :  { %p658_p3 = scmp.ne.s32.totalorder %s31_s16, %s657_s26  ;;  %p663_p5 = scmp.lt.s32.totalorder %s657_s26, %s657_s26 }
   0xe   :  { %p664_p6 = por %p663_p5, %p662_p4 }
  0x10   :  { %p665_p7 = pnand %p664_p6, %p658_p3 }
  0x12   :  { %668 = shalt.err (!%p665_p7)
}
  0x13   :  { %s755_s27 = smov 128   ;;  %s756_s28 = smov 8  }
  0x14   :  { %36 = dma.hbm_to_vmem [thread:$0]  %s1112_s1, 512, %s31_s16, [#allocation7], %s755_s27, %s755_s27, %s756_s28  }
  0x15   :  { %s669_s7 = scalar_lea.hbm %s1111_s0, 512 }
  0x16   :  { %p670_p8 = scmp.ne.s32.totalorder %s1111_s0, %s669_s7  ;;  %p673_p9 = scmp.lt.u32.totalorder %s669_s7, %s1111_s0 }
  0x18   :  { %p675_p10 = pnand %p673_p9, %p670_p8 }
  0x1a   :  { %678 = shalt.err (!%p675_p10)
}
  0x1b   :  { %s679_s12 = scalar_lea.vmem %s787_s18, 512  ;;  %p684_p12 = scmp.lt.s32.totalorder %s787_s18, %s787_s18 }
  0x1c   :  { %p680_p11 = scmp.ne.s32.totalorder %s787_s18, %s679_s12  ;;  %p685_p13 = scmp.lt.s32.totalorder %s679_s12, %s679_s12 }
  0x1e   :  { %p686_p0 = por %p685_p13, %p684_p12 }
  0x20   :  { %p687_p1 = pnand %p686_p0, %p680_p11 }
  0x22   :  { %690 = shalt.err (!%p687_p1)
}
  0x23   :  { %24 = dma.hbm_to_vmem [thread:$0]  %s1111_s0, 512, %s787_s18, [#allocation4], %s755_s27, %s755_s27, %s756_s28  }
  0x24   :  { %s757_s14 = smov [#allocation8]   ;;  %s758_s16 = smov [#allocation9]  }
  0x25   :  { %s42_s15 = sshll.u32 %s757_s14, 4  ;;  %s54_s17 = sshll.u32 %s758_s16, 4  ;;  %s43_s15 = int_to_ptr.vmem [resolvable:$true] %s42_s15  ;;  %s824_s17 = int_to_ptr.vmem [resolvable:$true] %s54_s17 }
  0x26   :  { %s691_s21 = scalar_lea.hbm %s1113_s2, 512 }
  0x27   :  { %p692_p2 = scmp.ne.s32.totalorder %s1113_s2, %s691_s21  ;;  %p695_p3 = scmp.lt.u32.totalorder %s691_s21, %s1113_s2 }
  0x29   :  { %p697_p4 = pnand %p695_p3, %p692_p2 }
  0x2b   :  { %700 = shalt.err (!%p697_p4)
}
  0x2c   :  { %s701_s0 = scalar_lea.vmem %s43_s15, 512  ;;  %p706_p6 = scmp.lt.s32.totalorder %s43_s15, %s43_s15 }
  0x2d   :  { %p702_p5 = scmp.ne.s32.totalorder %s43_s15, %s701_s0  ;;  %p707_p7 = scmp.lt.s32.totalorder %s701_s0, %s701_s0 }
  0x2f   :  { %p708_p8 = por %p707_p7, %p706_p6 }
  0x31   :  { %p709_p9 = pnand %p708_p8, %p702_p5 }
  0x33   :  { %712 = shalt.err (!%p709_p9)
}
  0x34   :  { %48 = dma.hbm_to_vmem [thread:$0]  %s1113_s2, 512, %s43_s15, [#allocation7], %s755_s27, %s755_s27, %s756_s28  }
  0x35   :  { %s713_s5 = scalar_lea.hbm %s1114_s3, 512 }
  0x36   :  { %p714_p10 = scmp.ne.s32.totalorder %s1114_s3, %s713_s5  ;;  %p717_p11 = scmp.lt.u32.totalorder %s713_s5, %s1114_s3 }
  0x38   :  { %p719_p12 = pnand %p717_p11, %p714_p10 }
  0x3a   :  { %722 = shalt.err (!%p719_p12)
}
  0x3b   :  { %s723_s10 = scalar_lea.vmem %s824_s17, 512  ;;  %p728_p0 = scmp.lt.s32.totalorder %s824_s17, %s824_s17 }
  0x3c   :  { %p724_p13 = scmp.ne.s32.totalorder %s824_s17, %s723_s10  ;;  %p729_p1 = scmp.lt.s32.totalorder %s723_s10, %s723_s10 }
  0x3e   :  { %p730_p2 = por %p729_p1, %p728_p0 }
  0x40   :  { %p731_p3 = pnand %p730_p2, %p724_p13 }
  0x42   :  { %734 = shalt.err (!%p731_p3)
}
  0x43   :  { %60 = dma.hbm_to_vmem [thread:$0]  %s1114_s3, 512, %s824_s17, [#allocation10], %s755_s27, %s755_s27, %s756_s28  }
  0x44   :  { %745 = dma.done.wait [#allocation4], 512  }
  0x45   :  { %746 = vsyncadd [#allocation4], 4294966784 }
  0x46   :  { %747 = dma.done.wait [#allocation7], 1024  }
  0x47   :  { %748 = vsyncadd [#allocation7], 4294966272 }
  0x48   :  { %749 = dma.done.wait [#allocation10], 512  }
  0x49   :  { %750 = vsyncadd [#allocation10], 4294966784  ;;  %v251_v0 = vlaneseq  ;;  %v274_v11 = vld [vmem:[#allocation6] sm:$0xff]  ;;  %v275_v12 = vld [vmem:[#allocation6 + $0x8] sm:$0xff]  ;;  %v759_v23 = vmov 0.0   ;;  %vm1118_vm12 = vmmov 1  }
  0x4a   :  { %v276_v13 = vld [vmem:[#allocation6 + $0x10] sm:$0xff]  ;;  %v277_v16 = vld [vmem:[#allocation6 + $0x18] sm:$0xff]  ;;  %vm278_vm1 = vcmp.gt.f32.partialorder %v274_v11, 0.5  ;;  %v270_v17 = vld [vmem:[#allocation3] sm:$0xff]  ;;  %vm279_vm2 = vcmp.gt.f32.partialorder %v275_v12, 0.5 }
  0x4b   :  { %v252_v1 = vshrl.u32 %v251_v0, 7  ;;  %v257_v2 = vand.u32 127, %v251_v0  ;;  %v271_v18 = vld [vmem:[#allocation3 + $0x8] sm:$0xff]  ;;  %vm280_vm3 = vcmp.gt.f32.partialorder %v276_v13, 0.5  ;;  %vm281_vm4 = vcmp.gt.f32.partialorder %v277_v16, 0.5  ;;  %v272_v21 = vld [vmem:[#allocation3 + $0x10] sm:$0xff]  ;;  %vm919_vm13 = vmxor %vm278_vm1, %vm1118_vm12 }
  0x4c   :  { %v273_v22 = vld [vmem:[#allocation3 + $0x18] sm:$0xff]  ;;  %v310_v25 = vsub.f32 1.0, %v270_v17  ;;  %v311_v27 = vsub.f32 1.0, %v271_v18  ;;  %v312_v28 = vsub.f32 1.0, %v272_v21  ;;  %v294_v40 = vadd.f32 1e-06, %v270_v17  ;;  %vm925_vm14 = vmxor %vm279_vm2, %vm1118_vm12 }
  0x4d   :  { %v253_v3 = vadd.s32 8, %v252_v1  ;;  %v254_v4 = vadd.s32 16, %v252_v1  ;;  %v255_v5 = vadd.s32 24, %v252_v1  ;;  %v258_v6 = vmul.u32 128, %v252_v1  ;;  %v913_v43 = vld [vmem:[#allocation9] sm:$0xff]  ;;  %v915_v45 = vld [vmem:[#allocation9 + $0x8] sm:$0xff] }
  0x4e   :  { %v313_v29 = vsub.f32 1.0, %v273_v22  ;;  %v314_v32 = vadd.f32 1e-06, %v310_v25  ;;  %v315_v36 = vadd.f32 1e-06, %v311_v27  ;;  %vm1120_vm15 = vcmp.gt.f32.partialorder %v913_v43, 0.5 }
  0x4f   :  { %v259_v7 = vmul.u32 128, %v253_v3  ;;  %v260_v8 = vmul.u32 128, %v254_v4  ;;  %v861_v9 = vadd.s32 %v258_v6, %v257_v2  ;;  %v316_v37 = vadd.f32 1e-06, %v312_v28  ;;  %v936_v51 = vld [vmem:[#allocation9 + $0x10] sm:$0xff]  ;;  %v970_v56 = vld [vmem:[#allocation9 + $0x18] sm:$0xff] }
  0x50   :  { %v261_v10 = vmul.u32 128, %v255_v5  ;;  %v317_v39 = vadd.f32 1e-06, %v313_v29  ;;  %607 = vlog2.f32 %v314_v32  ;;  %v295_v42 = vadd.f32 1e-06, %v271_v18  ;;  %v358_v26 = vld [vmem:[#allocation8] sm:$0xff] }
  0x51   :  { %v863_v14 = vadd.s32 %v259_v7, %v257_v2  ;;  %v865_v15 = vadd.s32 %v260_v8, %v257_v2  ;;  %vm1121_vm0 = vcmp.lt.s32.totalorder %v861_v9, 512  ;;  %609 = vlog2.f32 %v315_v36  ;;  %v361_v47 = vld [vmem:[#allocation8 + $0x18] sm:$0xff] }
  0x52   :  { %v868_v19 = vadd.s32 %v261_v10, %v257_v2  ;;  %vm873_vm5 = vmand %vm1121_vm0, %vm278_vm1  ;;  %611 = vlog2.f32 %v316_v37  ;;  %v296_v44 = vadd.f32 1e-06, %v272_v21  ;;  %v297_v48 = vadd.f32 1e-06, %v273_v22 }
  0x53   :  { %vm1122_vm6 = vcmp.lt.s32.totalorder %v863_v14, 512  ;;  %vm1117_vm7 = vcmp.lt.s32.totalorder %v865_v15, 512  ;;  %v568_v24 = vsel %vm873_vm5, 1.0, %v759_v23  ;;  %613 = vlog2.f32 %v317_v39 }
  0x54   :  { %vm1116_vm8 = vcmp.lt.s32.totalorder %v868_v19, 512  ;;  %vm886_vm9 = vmand %vm1122_vm6, %vm279_vm2  ;;  %615 = vlog2.f32 %v294_v40  ;;  %vm1123_vm1 = vcmp.gt.f32.partialorder %v915_v45, 0.5  ;;  %v382_v50 = vadd.f32 1e-06, %v358_v26 }
  0x55   :  { %vm893_vm10 = vmand %vm1117_vm7, %vm280_vm3  ;;  %v569_v31 = vsel %vm886_vm9, 1.0, %v759_v23  ;;  %617 = vlog2.f32 %v295_v42  ;;  %vm1124_vm7 = vcmp.gt.f32.partialorder %v936_v51, 0.5  ;;  %v401_v30 = vsub.f32 1.0, %v361_v47 }
  0x56   :  { %vm903_vm11 = vmand %vm1116_vm8, %vm281_vm4  ;;  %v570_v34 = vsel %vm893_vm10, 1.0, %v759_v23  ;;  %v339_v35 = vadd.f32 %v569_v31, %v568_v24  ;;  %619 = vlog2.f32 %v296_v44  ;;  %v359_v44 = vld [vmem:[#allocation8 + $0x8] sm:$0xff] }
  0x57   :  { %v571_v38 = vsel %vm903_vm11, 1.0, %v759_v23  ;;  %vm932_vm8 = vmxor %vm280_vm3, %vm1118_vm12  ;;  %621 = vlog2.f32 %v297_v48  ;;  %v398_v48 = vsub.f32 1.0, %v358_v26  ;;  %v383_v52 = vadd.f32 1e-06, %v359_v44 }
  0x58   :  { %v340_v41 = vadd.f32 %v570_v34, %v339_v35  ;;  %vm941_vm2 = vmxor %vm281_vm4, %vm1118_vm12  ;;  %623 = vlog2.f32 %v382_v50  ;;  %v405_v58 = vadd.f32 1e-06, %v401_v30 }
  0x59   :  { %vm949_vm3 = vmand %vm1121_vm0, %vm1120_vm15  ;;  %v402_v55 = vadd.f32 1e-06, %v398_v48  ;;  %625 = vlog2.f32 %v383_v52 }
  0x5a   :  { %v341_v46 = vadd.f32 %v571_v38, %v340_v41  ;;  %vm958_vm4 = vmand %vm1122_vm6, %vm1123_vm1  ;;  %v608_v57 = vpop.eup %607  ;;  %v572_v59 = vsel %vm949_vm3, 1.0, %v759_v23  ;;  %vm369_vm1 = vcmp.gt.f32.partialorder %v970_v56, 0.5 }
  0x5b   :  { %vm966_vm12 = vmand %vm1121_vm0, %vm919_vm13  ;;  %v573_v60 = vsel %vm958_vm4, 1.0, %v759_v23  ;;  %v610_v61 = vpop.eup %609  ;;  %v319_v62 = vmul.f32 0.6931472, %v608_v57  ;;  %vm1149_vm13 = vcmp.lt.s32.totalorder %v865_v15, 512  ;;  %627 = vlog2.f32 %v402_v55 }
  0x5c   :  { %448 = vadd.xlane.f32.xlu0 %v341_v46  ;;  %vm976_vm15 = vmand %vm1122_vm6, %vm925_vm14  ;;  %v612_v0 = vpop.eup %611  ;;  %v321_v2 = vmul.f32 0.6931472, %v610_v61  ;;  %v428_v7 = vadd.f32 %v573_v60, %v572_v59  ;;  %v360_v46 = vld [vmem:[#allocation8 + $0x10] sm:$0xff]  ;;  %v385_v60 = vadd.f32 1e-06, %v361_v47 }
  0x5d   :  { %vm990_vm0 = vmand %vm1149_vm13, %vm1124_vm7  ;;  %v614_v3 = vpop.eup %613  ;;  %v323_v5 = vmul.f32 0.6931472, %v612_v0  ;;  %v326_v6 = vsel %vm966_vm12, %v319_v62, 0.0  ;;  %v400_v49 = vsub.f32 1.0, %v360_v46  ;;  %v384_v59 = vadd.f32 1e-06, %v360_v46 }
  0x5e   :  { %vm1152_vm14 = vmmov %vm1149_vm13  ;;  %vm1155_vm13 = vcmp.lt.s32.totalorder %v868_v19, 512  ;;  %v616_v8 = vpop.eup %615  ;;  %v325_v10 = vmul.f32 0.6931472, %v614_v3  ;;  %v327_v11 = vsel %vm976_vm15, %v321_v2, 0.0  ;;  %v574_v12 = vsel %vm990_vm0, 1.0, %v759_v23 }
  0x5f   :  { %vm998_vm6 = vmand %vm1152_vm14, %vm932_vm8  ;;  %v618_v13 = vpop.eup %617  ;;  %v353_v17 = vadd.f32 %v327_v11, %v326_v6  ;;  %v299_v18 = vmul.f32 0.6931472, %v616_v8  ;;  %v429_v32 = vadd.f32 %v574_v12, %v428_v7  ;;  %v404_v33 = vadd.f32 1e-06, %v400_v49 }
  0x60   :  { %vm1007_vm7 = vmand %vm1155_vm13, %vm941_vm2  ;;  %v328_v16 = vsel %vm998_vm6, %v323_v5, 0.0  ;;  %v620_v22 = vpop.eup %619  ;;  %v301_v25 = vmul.f32 0.6931472, %v618_v13  ;;  %vm1162_vm6 = vcmp.gt.f32.partialorder %v913_v43, 0.5  ;;  %vm1165_vm14 = vcmp.lt.s32.totalorder %v861_v9, 512 }
  0x61   :  { %vm1158_vm8 = vmmov %vm1155_vm13  ;;  %v329_v24 = vsel %vm1007_vm7, %v325_v10, 0.0  ;;  %v622_v27 = vpop.eup %621  ;;  %v354_v28 = vadd.f32 %v353_v17, %v328_v16  ;;  %v303_v29 = vmul.f32 0.6931472, %v620_v22  ;;  %v306_v31 = vsel %vm873_vm5, %v299_v18, 0.0 }
  0x62   :  { %vm1024_vm12 = vmand %vm1158_vm8, %vm369_vm1  ;;  %v305_v34 = vmul.f32 0.6931472, %v622_v27  ;;  %v307_v35 = vsel %vm886_vm9, %v301_v25, 0.0  ;;  %vm1161_vm5 = vmmov 1   ;;  %vm1163_vm9 = vcmp.gt.f32.partialorder %v915_v45, 0.5  ;;  %v624_v61 = vpop.eup %623 }
  0x63   :  { %v575_v36 = vsel %vm1024_vm12, 1.0, %v759_v23  ;;  %v355_v37 = vadd.f32 %v354_v28, %v329_v24  ;;  %v308_v38 = vsel %vm893_vm10, %v303_v29, 0.0  ;;  %v346_v39 = vadd.f32 %v307_v35, %v306_v31  ;;  %vm374_vm7 = vmxor %vm1162_vm6, %vm1161_vm5  ;;  %v626_v62 = vpop.eup %625 }
  0x64   :  { %v309_v40 = vsel %vm903_vm11, %v305_v34, 0.0  ;;  %v430_v41 = vadd.f32 %v575_v36, %v429_v32  ;;  %v399_v23 = vsub.f32 1.0, %v359_v44  ;;  %vm375_vm10 = vmxor %vm1163_vm9, %vm1161_vm5  ;;  %vm1164_vm11 = vcmp.gt.f32.partialorder %v936_v51, 0.5 }
  0x65   :  { %468 = vadd.xlane.f32.xlu1 %v355_v37  ;;  %v347_v20 = vadd.f32 %v346_v39, %v308_v38  ;;  %vm376_vm15 = vmxor %vm1164_vm11, %vm1161_vm5  ;;  %v387_v0 = vmul.f32 0.6931472, %v624_v61  ;;  %v628_v1 = vpop.eup %627  ;;  %v389_v45 = vmul.f32 0.6931472, %v626_v62  ;;  %vm1168_vm8 = vcmp.lt.s32.totalorder %v863_v14, 512 }
  0x66   :  { %v403_v57 = vadd.f32 1e-06, %v399_v23  ;;  %vm377_vm2 = vmxor %vm369_vm1, %vm1161_vm5  ;;  %v407_v3 = vmul.f32 0.6931472, %v628_v1  ;;  %vm1171_vm1 = vcmp.lt.s32.totalorder %v865_v15, 512 }
  0x67   :  { %v348_v42 = vadd.f32 %v347_v20, %v309_v40  ;;  %vm1055_vm13 = vmand %vm1165_vm14, %vm374_vm7  ;;  %v394_v56 = vsel %vm949_vm3, %v387_v0, 0.0  ;;  %v395_v6 = vsel %vm958_vm4, %v389_v45, 0.0  ;;  %vm1174_vm7 = vcmp.lt.s32.totalorder %v868_v19, 512 }
  0x68   :  { %629 = vlog2.f32 %v403_v57  ;;  %vm1061_vm6 = vmand %vm1168_vm8, %vm375_vm10  ;;  %v414_v8 = vsel %vm1055_vm13, %v407_v3, 0.0  ;;  %v435_v12 = vadd.f32 %v395_v6, %v394_v56 }
  0x69   :  { %458 = vadd.xlane.f32.xlu0 %v348_v42  ;;  %495 = vadd.xlane.f32.xlu1 %v430_v41  ;;  %631 = vlog2.f32 %v404_v33  ;;  %vm1069_vm5 = vmand %vm1171_vm1, %vm376_vm15 }
  0x6a   :  { %633 = vlog2.f32 %v405_v58  ;;  %vm1077_vm9 = vmand %vm1174_vm7, %vm377_vm2 }
  0x6b   :  { %635 = vlog2.f32 %v384_v59 }
  0x6c   :  { %637 = vlog2.f32 %v385_v60 }
  0x72   :  { %v630_v2 = vpop.eup %629 }
  0x73   :  { %v632_v4 = vpop.eup %631  ;;  %v409_v5 = vmul.f32 0.6931472, %v630_v2 }
  0x74   :  { %v634_v14 = vpop.eup %633  ;;  %v411_v53 = vmul.f32 0.6931472, %v632_v4 }
  0x75   :  { %v636_v15 = vpop.eup %635  ;;  %v413_v10 = vmul.f32 0.6931472, %v634_v14  ;;  %v415_v11 = vsel %vm1061_vm6, %v409_v5, 0.0 }
  0x76   :  { %v638_v13 = vpop.eup %637  ;;  %v416_v54 = vsel %vm1069_vm5, %v411_v53, 0.0  ;;  %v442_v16 = vadd.f32 %v415_v11, %v414_v8  ;;  %v391_v19 = vmul.f32 0.6931472, %v636_v15 }
  0x77   :  { %v417_v17 = vsel %vm1077_vm9, %v413_v10, 0.0  ;;  %v393_v18 = vmul.f32 0.6931472, %v638_v13 }
  0x78   :  { %v443_v22 = vadd.f32 %v442_v16, %v416_v54  ;;  %v396_v24 = vsel %vm990_vm0, %v391_v19, 0.0 }
  0x79   :  { %v397_v25 = vsel %vm1024_vm12, %v393_v18, 0.0  ;;  %v436_v27 = vadd.f32 %v435_v12, %v396_v24 }
  0x7a   :  { %v444_v28 = vadd.f32 %v443_v22, %v417_v17 }
  0x7b   :  { %v437_v29 = vadd.f32 %v436_v27, %v397_v25 }
  0x7c   :  { %515 = vadd.xlane.f32.xlu1 %v444_v28 }
  0x7d   :  { %505 = vadd.xlane.f32.xlu0 %v437_v29 }
  0xe9   :  { %v449_v31 = vpop.xlane.xlu0 %448 }
  0xea   :  { %v450_v32 = vrot.slane %v449_v31, 4 }
  0xec   :  { %v451_v34 = vadd.f32 %v450_v32, %v449_v31 }
  0xee   :  { %v452_v35 = vrot.slane %v451_v34, 2 }
  0xf0   :  { %v453_v36 = vadd.f32 %v452_v35, %v451_v34 }
  0xf2   :  { %v454_v37 = vrot.slane %v453_v36, 1  ;;  %v469_v39 = vpop.xlane.xlu1 %468 }
  0xf3   :  { %v470_v40 = vrot.slane %v469_v39, 4 }
  0xf4   :  { %v455_v38 = vadd.f32 %v454_v37, %v453_v36 }
  0xf5   :  { %v471_v63 = vadd.f32 %v470_v40, %v469_v39 }
  0xf6   :  { %578 = vpush %v455_v38  ;;  %v459_v20 = vpop.xlane.xlu0 %458  ;;  %v496_v52 = vpop.xlane.xlu1 %495 }
  0xf7   :  { %v472_v41 = vrot.slane %v471_v63, 2  ;;  %v460_v21 = vrot.slane %v459_v20, 4  ;;  %v497_v58 = vrot.slane %v496_v52, 4 }
  0xf9   :  { %v461_v42 = vadd.f32 %v460_v21, %v459_v20  ;;  %v473_v26 = vadd.f32 %v472_v41, %v471_v63  ;;  %v498_v61 = vadd.f32 %v497_v58, %v496_v52 }
  0xfb   :  { %v462_v44 = vrot.slane %v461_v42, 2  ;;  %v474_v46 = vrot.slane %v473_v26, 1  ;;  %v499_v1 = vrot.slane %v498_v61, 2 }
  0xfd   :  { %v463_v47 = vadd.f32 %v462_v44, %v461_v42  ;;  %v475_v23 = vadd.f32 %v474_v46, %v473_v26  ;;  %v500_v51 = vadd.f32 %v499_v1, %v498_v61 }
  0xff   :  { %v464_v48 = vrot.slane %v463_v47, 1  ;;  %v501_v4 = vrot.slane %v500_v51, 1 }
 0x101   :  { %v465_v49 = vadd.f32 %v464_v48, %v463_v47  ;;  %v502_v14 = vadd.f32 %v501_v4, %v500_v51 }
 0x103   :  { %580 = vpush %v465_v49 }
 0x104   :  { %582 = vpush %v475_v23 }
 0x109   :  { %v516_v57 = vpop.xlane.xlu1 %515 }
 0x10a   :  { %v506_v55 = vpop.xlane.xlu0 %505  ;;  %v517_v59 = vrot.slane %v516_v57, 4 }
 0x10b   :  { %v507_v33 = vrot.slane %v506_v55, 4 }
 0x10c   :  { %v518_v62 = vadd.f32 %v517_v59, %v516_v57 }
 0x10d   :  { %v508_v60 = vadd.f32 %v507_v33, %v506_v55 }
 0x10e   :  { %v519_v43 = vrot.slane %v518_v62, 2 }
 0x10f   :  { %v509_v0 = vrot.slane %v508_v60, 2 }
 0x110   :  { %v520_v3 = vadd.f32 %v519_v43, %v518_v62 }
 0x111   :  { %v510_v2 = vadd.f32 %v509_v0, %v508_v60 }
 0x112   :  { %v521_v9 = vrot.slane %v520_v3, 1 }
 0x113   :  { %v511_v56 = vrot.slane %v510_v2, 1 }
 0x114   :  { %v522_v7 = vadd.f32 %v521_v9, %v520_v3 }
 0x115   :  { %v512_v5 = vadd.f32 %v511_v56, %v510_v2 }
 0x127   :  { %s579_s3 = spop %578 }
 0x128   :  { %v477_v50 = vstv %s579_s3 }
 0x129   :  { %639 = vrcp.f32 %v477_v50 }
 0x133   :  { %v640_v30 = vpop.eup %639 }
 0x134   :  { %584 = vpush %v640_v30  ;;  %s1093_s27 = spop %580 }
 0x135   :  { %s1095_s28 = spop %582 }
 0x165   :  { %s585_s12 = spop %584 }
 0x166   :  { %s480_s1 = smul.f32 512.0, %s585_s12 }
 0x168   :  { %s576_s13 = sadd.f32 -1.0, %s480_s1  ;;  %s481_s14 = smul.f32 0.5, %s480_s1 }
 0x16a   :  { %v483_v45 = vstv %s576_s13  ;;  %s487_s15 = smul.f32 %s1093_s27, %s481_s14  ;;  %s735_s27 = scalar_lea.hbm %s1115_s4, 16 }
 0x16b   :  { %641 = vrcp.f32 %v483_v45  ;;  %p736_p4 = scmp.ne.s32.totalorder %s1115_s4, %s735_s27  ;;  %p739_p5 = scmp.lt.u32.totalorder %s735_s27, %s1115_s4 }
 0x16d   :  { %p741_p6 = pnand %p739_p5, %p736_p4 }
 0x175   :  { %v642_v6 = vpop.eup %641 }
 0x176   :  { %586 = vpush %v642_v6 }
 0x177   :  { %588 = vpush %v502_v14 }
 0x178   :  { %590 = vpush %v512_v5 }
 0x179   :  { %592 = vpush %v522_v7 }
 0x1a7   :  { %s587_s16 = spop %586 }
 0x1a8   :  { %s486_s17 = smul.f32 %s587_s16, %s481_s14  ;;  %s589_s19 = spop %588 }
 0x1a9   :  { %v524_v53 = vstv %s589_s19  ;;  %s591_s22 = spop %590 }
 0x1aa   :  { %s488_s20 = smul.f32 %s1095_s28, %s486_s17  ;;  %643 = vrcp.f32 %v524_v53  ;;  %s593_s23 = spop %592 }
 0x1ac   :  { %s489_s21 = sadd.f32 %s488_s20, %s487_s15 }
 0x1ae   :  { %s490_s6 = ssub.f32 0.0, %s489_s21 }
 0x1b0   :  { %s493_s9 = smul.f32 0.001953125, %s490_s6 }
 0x1b4   :  { %v644_v8 = vpop.eup %643 }
 0x1b5   :  { %594 = vpush %v644_v8 }
 0x1e6   :  { %s595_s24 = spop %594 }
 0x1e7   :  { %s527_s25 = smul.f32 512.0, %s595_s24 }
 0x1e9   :  { %s577_s0 = sadd.f32 -1.0, %s527_s25  ;;  %s528_s18 = smul.f32 0.5, %s527_s25 }
 0x1eb   :  { %v530_v15 = vstv %s577_s0  ;;  %s534_s30 = smul.f32 %s591_s22, %s528_s18 }
 0x1ec   :  { %645 = vrcp.f32 %v530_v15 }
 0x1f6   :  { %v646_v10 = vpop.eup %645 }
 0x1f7   :  { %596 = vpush %v646_v10 }
 0x228   :  { %s597_s26 = spop %596 }
 0x229   :  { %s533_s29 = smul.f32 %s597_s26, %s528_s18 }
 0x22b   :  { %s535_s5 = smul.f32 %s593_s23, %s533_s29 }
 0x22d   :  { %s536_s7 = sadd.f32 %s535_s5, %s534_s30 }
 0x22f   :  { %s537_s8 = ssub.f32 0.0, %s536_s7 }
 0x231   :  { %s540_s10 = smul.f32 0.001953125, %s537_s8 }
 0x233   :  { %s541_s2 = sadd.f32 %s540_s10, %s493_s9 }
 0x235   :  { %543 = sst [smem:[#allocation11]] %s541_s2 }
 0x236   :  { %744 = shalt.err (!%p741_p6)
}
 0x237   :  { %s761_s14 = smov [#allocation11]  }
 0x238   :  { %551 = dma.smem_to_hbm %s761_s14, 16, %s1115_s4, [#allocation5]  }
 0x239   :  { %751 = dma.done.wait [#allocation5], 16  }
 0x23a   :  { %752 = vsyncadd [#allocation5], 4294967280 }
 0x23b   :  { %555 = sfence }
 0x23c   :  { %556 = vsyncpa [#allocation4], 1 }
 0x23d   :  { %557 = vsyncpa [#allocation7], 1 }
 0x23e   :  { %558 = vsyncpa [#allocation10], 1 }
 0x23f   :  { %559 = vsyncpa [#allocation5], 1 }

</bundles_post_ra>
